<compile_context>
chip_gen: v5e
topology: v5e:2x2
jax: 0.10.0
libtpu: 0.0.40
codegen_flags: <defaults>
</compile_context>

<pallas_src>
import jax
import jax.numpy as jnp
from jax.experimental import pallas as pl
from jax.experimental.pallas import tpu as pltpu


def _mf_tile_kernel(u_ref, k_ref, v_ref, o_ref):
    # u_ref: (E, TB)  learnable user rows for this batch tile (feature-major)
    # k_ref: (1, TB)  known-feature scalar per user in this tile
    # v_ref: (E, TB)  learnable item rows for this batch tile
    # o_ref: (1, TB)  per-pair dot products (lane-dense output)
    combined = u_ref[...] + k_ref[...]           # sublane broadcast (E,TB)+(1,TB)
    prod = combined * v_ref[...]                 # VPU elementwise (E, TB)
    # Cross-sublane reduce over the E features -> (1, TB), already lane-major.
    o_ref[...] = jnp.sum(prod, axis=0, keepdims=True)


def _pick_tile(padded_b128, target=8192):
    """Pick a lane-dense batch tile (static Python int, multiple of 128).

    padded_b128 is B rounded up to a multiple of 128.
    - small/medium batches: one zero-waste tile, split in two when it divides
      evenly (>= 2 tiles lets v7x shard across both TensorCores);
    - large batches: largest power-of-two tile <= target with <= 12.5% padding
      waste, so unlucky B never nearly doubles the work.
    """
    if padded_b128 <= target:
        half = padded_b128 // 2
        if padded_b128 >= 1024 and half % 128 == 0:
            return half
        return padded_b128
    best = 128          # always valid: padded_b128 is a multiple of 128
    tb = 256
    while tb <= target:
        waste = (-padded_b128) % tb
        if waste <= padded_b128 // 8:
            best = tb
        tb *= 2
    return best


def _reference_forward(u, v, known_feature, user_emb, item_emb, known_emb):
    """Pure-JAX reference of the PyTorch forward (also the tiny-B fast path)."""
    del known_feature
    u_learn = jnp.take(user_emb, u, axis=0)      # (B, E)
    v_learn = jnp.take(item_emb, v, axis=0)      # (B, E)
    known = jnp.take(known_emb, u, axis=0)       # (B, 1)
    return ((u_learn + known) * v_learn).sum(axis=1)


def mf_with_known_feature_forward(u, v, known_feature,
                                  user_emb, item_emb, known_emb,
                                  *, min_pallas_batch=1024, tile_target=8192):
    """Pallas equivalent of MF_with_known_feature.forward(u, v, known_feature)."""
    del known_feature  # unused, matching the PyTorch forward
    B = u.shape[0]
    E = user_emb.shape[1]
    u = u.astype(jnp.int32)
    v = v.astype(jnp.int32)

    # Tiny-B fast path: Pallas launch + padding + gathers dominate for small B.
    if B < min_pallas_batch:
        return _reference_forward(u, v, None, user_emb, item_emb, known_emb)

    # Pad B to a lane multiple first, then pick the tile and the final padding.
    padded_b128 = pl.cdiv(B, 128) * 128
    TB = _pick_tile(padded_b128, tile_target)
    padded_B = pl.cdiv(padded_b128, TB) * TB
    pad = padded_B - B
    # Pad indices with 0 (a valid table row); padded outputs are sliced off.
    u_pad = jnp.pad(u, (0, pad))
    v_pad = jnp.pad(v, (0, pad))

    # One-time tiny table transposes (O(rows*E)) + gather along axis=1 produce
    # the feature-major, lane-dense (E, padded_B) slabs directly — no big
    # (padded_B, E) materialization followed by a transpose round trip.
    u_rows_t = jnp.take(user_emb.T, u_pad, axis=1)    # (E, padded_B) f32
    v_rows_t = jnp.take(item_emb.T, v_pad, axis=1)    # (E, padded_B) f32
    known_t = jnp.take(known_emb.T, u_pad, axis=1)    # (1, padded_B) f32

    grid = (padded_B // TB,)
    out = pl.pallas_call(
        _mf_tile_kernel,
        out_shape=jax.ShapeDtypeStruct((1, padded_B), jnp.float32),
        grid_spec=pltpu.PrefetchScalarGridSpec(
            num_scalar_prefetch=0,
            grid=grid,
            in_specs=[
                pl.BlockSpec((E, TB), lambda i: (0, i)),   # user rows tile
                pl.BlockSpec((1, TB), lambda i: (0, i)),   # known-feature tile
                pl.BlockSpec((E, TB), lambda i: (0, i)),   # item rows tile
            ],
            out_specs=pl.BlockSpec((1, TB), lambda i: (0, i)),
        ),
        compiler_params=pltpu.CompilerParams(
            dimension_semantics=("parallel",)),
    )(u_rows_t, known_t, v_rows_t)
    return out[0, :B]


def init_params(key, num_users, num_items, emb_size=32, known_feature_size=1):
    """Deterministic parameter init matching the module's __init__ shapes."""
    k1, k2, k3 = jax.random.split(key, 3)
    # .uniform_(0, 0.05) on the two learnable embedding tables
    user_emb = jax.random.uniform(
        k1, (num_users + 1, emb_size), jnp.float32, 0.0, 0.05)
    item_emb = jax.random.uniform(
        k2, (num_items + 1, emb_size), jnp.float32, 0.0, 0.05)
    # user_embedding_known_feature keeps PyTorch's default N(0, 1) init
    known_emb = jax.random.normal(
        k3, (num_users + 1, known_feature_size), jnp.float32)
    return user_emb, item_emb, known_emb


if __name__ == "__main__":
    # Small shapes implied by the module / data:
    #   num_users = 3, num_items = 3 -> embedding tables have 4 rows
    #   batch B = 6 interactions, emb_size = 32, known_feature_size = 1
    num_users, num_items = 3, 3
    emb_size, known_feature_size = 32, 1

    key = jax.random.PRNGKey(0)
    user_emb, item_emb, known_emb = init_params(
        key, num_users, num_items, emb_size, known_feature_size)

    # --- Demo batch from the reference data (forced through the Pallas path). ---
    u = jnp.array([1, 2, 3, 1, 2, 3], dtype=jnp.int32)
    v = jnp.array([1, 2, 3, 1, 2, 3], dtype=jnp.int32)
    known_feature = jnp.array([25., 30., 22., 25., 30., 22.], dtype=jnp.float32)

    out_small = mf_with_known_feature_forward(
        u, v, known_feature, user_emb, item_emb, known_emb,
        min_pallas_batch=0)                      # force the Pallas kernel
    out_small = jax.block_until_ready(out_small)
    ref_small = _reference_forward(u, v, known_feature,
                                   user_emb, item_emb, known_emb)
    assert out_small.shape == (u.shape[0],)
    assert jnp.allclose(out_small, ref_small, rtol=1e-5, atol=1e-5), (
        out_small, ref_small)

    # --- Larger batch to exercise the big-tile path (TB=8192, grid=(2,)). ---
    kb1, kb2 = jax.random.split(jax.random.PRNGKey(1))
    B_big = 16384
    u_big = jax.random.randint(kb1, (B_big,), 1, num_users + 1, dtype=jnp.int32)
    v_big = jax.random.randint(kb2, (B_big,), 1, num_items + 1, dtype=jnp.int32)
    kf_big = jnp.zeros((B_big,), jnp.float32)    # unused by forward()

    out_big = mf_with_known_feature_forward(
        u_big, v_big, kf_big, user_emb, item_emb, known_emb)
    out_big = jax.block_until_ready(out_big)
    ref_big = _reference_forward(u_big, v_big, kf_big,
                                 user_emb, item_emb, known_emb)
    assert out_big.shape == (B_big,)
    assert jnp.allclose(out_big, ref_big, rtol=1e-5, atol=1e-5)

    print("KERNEL_OK")
</pallas_src>

<mosaic_0001>
module attributes {stable_mosaic.version = 11 : i64} {
  func.func @_mf_tile_kernel(%arg0: i32, %arg1: memref<32x128xf32, #tpu.memory_space<vmem>>, %arg2: memref<1x128xf32, #tpu.memory_space<vmem>>, %arg3: memref<32x128xf32, #tpu.memory_space<vmem>>, %arg4: memref<1x128xf32, #tpu.memory_space<vmem>>) attributes {dimension_semantics = [#tpu.dimension_semantics<parallel>], iteration_bounds = array<i64: 1>, scalar_prefetch = 0 : i64, scratch_operands = 0 : i64, tpu.core_type = #tpu.core_type<tc>, window_params = [{transform_indices = @transform_0, window_bounds = array<i64: 32, 128>}, {transform_indices = @transform_1, window_bounds = array<i64: 1, 128>}, {transform_indices = @transform_2, window_bounds = array<i64: 32, 128>}, {transform_indices = @transform_3, window_bounds = array<i64: 1, 128>}]} {
    %c0 = arith.constant 0 : index
    %c0_0 = arith.constant 0 : index
    %0 = vector.load %arg1[%c0, %c0_0] : memref<32x128xf32, #tpu.memory_space<vmem>>, vector<32x128xf32>
    %c0_1 = arith.constant 0 : index
    %c0_2 = arith.constant 0 : index
    %1 = vector.load %arg2[%c0_1, %c0_2] : memref<1x128xf32, #tpu.memory_space<vmem>>, vector<1x128xf32>
    %2 = vector.broadcast %1 : vector<1x128xf32> to vector<32x128xf32>
    %3 = arith.addf %0, %2 : vector<32x128xf32>
    %c0_3 = arith.constant 0 : index
    %c0_4 = arith.constant 0 : index
    %4 = vector.load %arg3[%c0_3, %c0_4] : memref<32x128xf32, #tpu.memory_space<vmem>>, vector<32x128xf32>
    %5 = arith.mulf %3, %4 : vector<32x128xf32>
    %cst = arith.constant dense<0.000000e+00> : vector<128xf32>
    %6 = vector.multi_reduction <add>, %5, %cst [0] : vector<32x128xf32> to vector<128xf32>
    %7 = vector.shape_cast %6 : vector<128xf32> to vector<1x128xf32>
    %c0_5 = arith.constant 0 : index
    %c0_6 = arith.constant 0 : index
    %8 = vector.load %arg4[%c0_5, %c0_6] : memref<1x128xf32, #tpu.memory_space<vmem>>, vector<1x128xf32>
    tpu.vector_store %arg4[%c0_5, %c0_6], %7 {strides = array<i32>} : memref<1x128xf32, #tpu.memory_space<vmem>>, vector<1x128xf32>,
    return
  }
  func.func @transform_0(%arg0: i32) -> (i32, i32) {
    %c0_i32 = arith.constant 0 : i32
    %c0_i32_0 = arith.constant 0 : i32
    return %c0_i32, %arg0 : i32, i32
  }
  func.func @transform_1(%arg0: i32) -> (i32, i32) {
    %c0_i32 = arith.constant 0 : i32
    %c0_i32_0 = arith.constant 0 : i32
    return %c0_i32, %arg0 : i32, i32
  }
  func.func @transform_2(%arg0: i32) -> (i32, i32) {
    %c0_i32 = arith.constant 0 : i32
    %c0_i32_0 = arith.constant 0 : i32
    return %c0_i32, %arg0 : i32, i32
  }
  func.func @transform_3(%arg0: i32) -> (i32, i32) {
    %c0_i32 = arith.constant 0 : i32
    %c0_i32_0 = arith.constant 0 : i32
    return %c0_i32, %arg0 : i32, i32
  }
}

</mosaic_0001>

<bundles_post_ra>
// kernel: tpu_custom_call.1
= control target key start
LH: loop header
LB: loop body
LE: loop exit
PB: predicated region body
PF: predicated region fallthrough
CT: control target
= control target key end

     0   :  { %8 = vsyncpa [#allocation3], 0  ;;  %s255_s0 = inlined_call_operand.hbm [shape: f32[32,128], index: 0, kind: input, shape index: {}]   ;;  %s256_s1 = inlined_call_operand.hbm [shape: f32[1,128], index: 1, kind: input, shape index: {}]   ;;  %s257_s2 = inlined_call_operand.hbm [shape: f32[32,128], index: 2, kind: input, shape index: {}]   ;;  %s258_s3 = inlined_call_operand.hbm [shape: f32[1,128], index: 3, kind: output, shape index: {}]  }
   0x1   :  { %9 = vsyncpa [#allocation6], 0  ;;  %s29_s14 = sshll.u32 %s256_s1, 4  ;;  %s30_s14 = int_to_ptr.hbm [resolvable:$true] %s29_s14 }
   0x2   :  { %10 = vsyncpa [#allocation4], 0  ;;  %s217_s15 = smov [#allocation5]   ;;  %s15_s19 = sshll.u32 %s255_s0, 4  ;;  %s16_s19 = int_to_ptr.hbm [resolvable:$true] %s15_s19 }
   0x3   :  { %s31_s16 = sshll.u32 %s217_s15, 4  ;;  %s218_s20 = smov [#allocation2]   ;;  %s32_s16 = int_to_ptr.vmem [resolvable:$true] %s31_s16 }
   0x4   :  { %34 = dma.hbm_to_vmem [thread:$0]  %s30_s14, 16, %s32_s16, [#allocation6]  }
   0x5   :  { %s17_s21 = sshll.u32 %s218_s20, 4  ;;  %s219_s22 = smov 128   ;;  %s18_s21 = int_to_ptr.vmem [resolvable:$true] %s17_s21 }
   0x6   :  { %s220_s23 = smov 8   ;;  %s39_s1 = sshll.u32 %s257_s2, 4  ;;  %s40_s1 = int_to_ptr.hbm [resolvable:$true] %s39_s1 }
   0x7   :  { %23 = dma.hbm_to_vmem [thread:$0]  %s16_s19, 512, %s18_s21, [#allocation3], %s219_s22, %s219_s22, %s220_s23  }
   0x8   :  { %s221_s26 = smov [#allocation7]  }
   0x9   :  { %s41_s27 = sshll.u32 %s221_s26, 4  ;;  %s42_s27 = int_to_ptr.vmem [resolvable:$true] %s41_s27 }
   0xa   :  { %47 = dma.hbm_to_vmem [thread:$0]  %s40_s1, 512, %s42_s27, [#allocation6], %s219_s22, %s219_s22, %s220_s23  }
   0xb   :  { %211 = dma.done.wait [#allocation3], 512  }
   0xc   :  { %212 = vsyncadd [#allocation3], 4294966784 }
   0xd   :  { %213 = dma.done.wait [#allocation6], 528  }
   0xe   :  { %214 = vsyncadd [#allocation6], 4294966768  ;;  %v60_v0 = vld [vmem:[#allocation2] sm:$0xff]  ;;  %v61_v1 = vld [vmem:[#allocation2 + $0x8] sm:$0xff]  ;;  %s222_s0 = smov [#allocation8]   ;;  %s97_s30 = sshll.u32 %s258_s3, 4  ;;  %s98_s30 = int_to_ptr.hbm [resolvable:$true] %s97_s30 }
   0xf   :  { %v62_v2 = vld [vmem:[#allocation2 + $0x10] sm:$0xff]  ;;  %v63_v3 = vld [vmem:[#allocation2 + $0x18] sm:$0xff]  ;;  %v114_v4 = vld [vmem:[#allocation5] ss:$0 sm:$0xff]  ;;  %s95_s2 = sshll.u32 %s222_s0, 4  ;;  %s96_s2 = int_to_ptr.vmem [resolvable:$true] %s95_s2 }
  0x10   :  { %v72_v5 = vld [vmem:[#allocation7] sm:$0xff]  ;;  %v73_v6 = vld [vmem:[#allocation7 + $0x8] sm:$0xff]  ;;  %v74_v7 = vld [vmem:[#allocation7 + $0x10] sm:$0xff]  ;;  %v68_v8 = vadd.f32 %v114_v4, %v60_v0  ;;  %v69_v9 = vadd.f32 %v114_v4, %v61_v1  ;;  %v70_v10 = vadd.f32 %v114_v4, %v62_v2  ;;  %v71_v11 = vadd.f32 %v114_v4, %v63_v3 }
  0x11   :  { %v75_v12 = vld [vmem:[#allocation7 + $0x18] sm:$0xff] }
  0x12   :  { %v76_v13 = vmul.f32 %v72_v5, %v68_v8  ;;  %v77_v14 = vmul.f32 %v73_v6, %v69_v9  ;;  %v78_v15 = vmul.f32 %v74_v7, %v70_v10  ;;  %v79_v16 = vmul.f32 %v75_v12, %v71_v11 }
  0x14   :  { %v80_v17 = vadd.f32 %v77_v14, %v76_v13 }
  0x16   :  { %v81_v18 = vadd.f32 %v80_v17, %v78_v15 }
  0x18   :  { %v82_v19 = vadd.f32 %v81_v18, %v79_v16 }
  0x1a   :  { %v83_v20 = vrot.slane %v82_v19, 4 }
  0x1c   :  { %v84_v21 = vadd.f32 %v83_v20, %v82_v19 }
  0x1e   :  { %v85_v22 = vrot.slane %v84_v21, 2 }
  0x20   :  { %v86_v23 = vadd.f32 %v85_v22, %v84_v21 }
  0x22   :  { %v87_v24 = vrot.slane %v86_v23, 1 }
  0x24   :  { %v88_v25 = vadd.f32 %v87_v24, %v86_v23 }
  0x26   :  { %89 = vst [vmem:[#allocation8] sm:$0x1] %v88_v25 }
  0x27   :  { %100 = dma.vmem_to_hbm [thread:$0]  %s96_s2, 16, %s98_s30, [#allocation4]  }
  0x28   :  { %215 = dma.done.wait [#allocation4], 16  }
  0x29   :  { %216 = vsyncadd [#allocation4], 4294967280 }
  0x2a   :  { %105 = vsyncpa [#allocation3], 1 }
  0x2b   :  { %106 = vsyncpa [#allocation6], 1 }
  0x2c   :  { %107 = vsyncpa [#allocation4], 1 }

</bundles_post_ra>
